<compile_context>
chip_gen: v5e
topology: v5e:2x2
jax: 0.10.0
libtpu: 0.0.40
codegen_flags: <defaults>
</compile_context>

<pallas_src>
import functools
import math

import jax
import jax.numpy as jnp
from jax.experimental import pallas as pl
from jax.experimental.pallas import tpu as pltpu

_NEG_LOG_1E4 = -math.log(1e-4)  # = log(1e4), the RCE per-off-class weight


def _sce_kernel(pred_ref, labels_ref, out_ref, *, n_total, tile_n):
    i = pl.program_id(0)

    x = pred_ref[...].astype(jnp.float32)      # (TILE_N, C) logits (cast in-kernel)
    lbl = labels_ref[...]                      # (TILE_N, 1) int32
    tn, c = x.shape

    # Valid-row mask for the (possibly padded) remainder tile.
    row = jax.lax.broadcasted_iota(jnp.int32, (tn, 1), 0)
    valid = (i * tile_n + row) < n_total       # (TILE_N, 1) bool

    # One-hot(labels) built on-chip from a class iota.
    class_iota = jax.lax.broadcasted_iota(jnp.int32, (tn, c), 1)
    one_hot = class_iota == lbl                # (TILE_N, C) bool

    # Numerically-stable softmax, exp computed exactly once per element.
    m = jnp.max(x, axis=1, keepdims=True)
    shifted = x - m
    e = jnp.exp(shifted)                                      # EUP: 1x full tile
    sumexp = jnp.sum(e, axis=1, keepdims=True)                # (TILE_N, 1)
    p = e * pl.reciprocal(sumexp)                             # softmax (exact recip;
    #   column-only op, negligible vs the full-tile exp; keeps tight numerics)
    p = jnp.clip(p, 1e-7, 1.0)                                # torch.clamp(pred, 1e-7, 1)

    # CE per row: -log_softmax[label] = log(sumexp) - shifted[label]
    log_sumexp = jnp.log(sumexp)                              # (TILE_N, 1) column only
    shifted_lbl = jnp.sum(jnp.where(one_hot, shifted, 0.0), axis=1, keepdims=True)
    ce_per = log_sumexp - shifted_lbl                         # (TILE_N, 1)

    # RCE per row: -sum_c p * log(clamp(onehot, 1e-4, 1))
    #            = -log(1e-4) * (sum_c p - p_label)
    p_sum = jnp.sum(p, axis=1, keepdims=True)
    p_lbl = jnp.sum(jnp.where(one_hot, p, 0.0), axis=1, keepdims=True)
    rce_per = jnp.float32(_NEG_LOG_1E4) * (p_sum - p_lbl)     # (TILE_N, 1)

    # Per-tile partial sums (invalid / padded rows masked to 0).
    ce_sum = jnp.sum(jnp.where(valid, ce_per, 0.0))
    rce_sum = jnp.sum(jnp.where(valid, rce_per, 0.0))

    # Lane-dense (8, 128) partial output: lane 0 = ce_sum, lane 1 = rce_sum.
    lane = jax.lax.broadcasted_iota(jnp.int32, (8, 128), 1)
    out_ref[0] = jnp.where(lane == 0, ce_sum,
                           jnp.where(lane == 1, rce_sum, 0.0))


def _round_up(x, m):
    return ((x + m - 1) // m) * m


def _auto_tile_n(n, c, itemsize):
    # Conservative VMEM budget for the double-buffered pred tile: ~8 MiB total,
    # which fits v5e's 16 MiB scoped default and v7x's smaller 64 MiB VMEM
    # without raising vmem_limit_bytes.
    budget = 8 << 20
    t = budget // max(1, 2 * c * itemsize)
    t = max(8, min(1024, t))
    t = (t // 8) * 8
    return int(min(t, _round_up(n, 8)))


def sce_loss(pred, labels, *, alpha, beta, num_classes, tile_n=None):
    """pred: (N, C) float logits (any float dtype), labels: (N,) int.

    Returns scalar float32 SCE loss.
    """
    n, c = pred.shape
    assert c == num_classes
    itemsize = jnp.dtype(pred.dtype).itemsize

    if tile_n is None:
        tile_n = _auto_tile_n(n, c, itemsize)
    tile_n = max(8, (int(tile_n) // 8) * 8)
    num_tiles = -(-n // tile_n)

    labels2d = labels.astype(jnp.int32).reshape(n, 1)

    parts = pl.pallas_call(
        functools.partial(_sce_kernel, n_total=n, tile_n=tile_n),
        out_shape=jax.ShapeDtypeStruct((num_tiles, 8, 128), jnp.float32),
        grid=(num_tiles,),
        in_specs=[
            pl.BlockSpec((tile_n, c), lambda i: (i, 0)),   # logits tile (native dtype)
            pl.BlockSpec((tile_n, 1), lambda i: (i, 0)),   # labels tile
        ],
        out_specs=pl.BlockSpec((1, 8, 128), lambda i: (i, 0, 0)),
        compiler_params=pltpu.CompilerParams(
            dimension_semantics=("parallel",),
        ),
        cost_estimate=pl.CostEstimate(
            flops=8 * n * c,
            transcendentals=n * c + 2 * n,
            bytes_accessed=n * c * itemsize + n * 4 + num_tiles * 8 * 128 * 4,
        ),
    )(pred, labels2d)

    # Tiny final reduction + scaling in the wrapper (per-tile partials keep
    # accumulation precision and let tiles run on both TCs on v7x).
    ce_sum = jnp.sum(parts[:, 0, 0])
    rce_sum = jnp.sum(parts[:, 0, 1])
    return (jnp.float32(alpha) * ce_sum + jnp.float32(beta) * rce_sum) / jnp.float32(n)


def _reference(pred, labels, alpha, beta, num_classes):
    # Pure-JAX reference mirroring the PyTorch module.
    logp = jax.nn.log_softmax(pred.astype(jnp.float32), axis=1)
    ce = -jnp.mean(jnp.take_along_axis(logp, labels[:, None], axis=1))
    p = jnp.clip(jax.nn.softmax(pred.astype(jnp.float32), axis=1), 1e-7, 1.0)
    oh = jnp.clip(jax.nn.one_hot(labels, num_classes, dtype=jnp.float32), 1e-4, 1.0)
    rce = -jnp.sum(p * jnp.log(oh), axis=1)
    return alpha * ce + beta * jnp.mean(rce)


if __name__ == "__main__":
    key = jax.random.PRNGKey(0)
    k1, k2, k3, k4 = jax.random.split(key, 4)

    alpha, beta = 0.1, 1.0
    num_classes = 10

    # Case 1: multi-tile grid with a remainder tile (exercises masking + pipelining).
    n1 = 200
    pred1 = jax.random.normal(k1, (n1, num_classes), dtype=jnp.float32)
    labels1 = jax.random.randint(k2, (n1,), 0, num_classes, dtype=jnp.int32)
    loss1 = jax.block_until_ready(
        sce_loss(pred1, labels1, alpha=alpha, beta=beta,
                 num_classes=num_classes, tile_n=64))
    ref1 = _reference(pred1, labels1, alpha, beta, num_classes)
    assert jnp.allclose(loss1, ref1, rtol=1e-5, atol=1e-5), (loss1, ref1)

    # Case 2: tiny batch, auto tile size, single block.
    n2 = 8
    pred2 = jax.random.normal(k3, (n2, num_classes), dtype=jnp.float32)
    labels2 = jax.random.randint(k4, (n2,), 0, num_classes, dtype=jnp.int32)
    loss2 = jax.block_until_ready(
        sce_loss(pred2, labels2, alpha=alpha, beta=beta, num_classes=num_classes))
    ref2 = _reference(pred2, labels2, alpha, beta, num_classes)
    assert jnp.allclose(loss2, ref2, rtol=1e-5, atol=1e-5), (loss2, ref2)

    print("KERNEL_OK")
</pallas_src>

<mosaic_0001>
module attributes {stable_mosaic.version = 11 : i64} {
  func.func @_sce_kernel(%arg0: i32, %arg1: memref<64x10xf32, #tpu.memory_space<vmem>>, %arg2: memref<64x1xi32, #tpu.memory_space<vmem>>, %arg3: memref<1x8x128xf32, #tpu.memory_space<vmem>>) attributes {dimension_semantics = [#tpu.dimension_semantics<parallel>], iteration_bounds = array<i64: 4>, scalar_prefetch = 0 : i64, scratch_operands = 0 : i64, tpu.core_type = #tpu.core_type<tc>, window_params = [{transform_indices = @transform_0, window_bounds = array<i64: 64, 10>}, {transform_indices = @transform_1, window_bounds = array<i64: 64, 1>}, {transform_indices = @transform_2, window_bounds = array<i64: 1, 8, 128>}]} {
    %c0 = arith.constant 0 : index
    %c0_0 = arith.constant 0 : index
    %0 = vector.load %arg1[%c0, %c0_0] : memref<64x10xf32, #tpu.memory_space<vmem>>, vector<64x10xf32>
    %c0_1 = arith.constant 0 : index
    %c0_2 = arith.constant 0 : index
    %1 = vector.load %arg2[%c0_1, %c0_2] : memref<64x1xi32, #tpu.memory_space<vmem>>, vector<64x1xi32>
    %2 = tpu.iota {dimensions = array<i32: 0>} : vector<64x1xi32>
    %c64_i32 = arith.constant 64 : i32
    %3 = arith.muli %arg0, %c64_i32 : i32
    %4 = vector.broadcast %3 : i32 to vector<64x1xi32>
    %5 = arith.addi %4, %2 : vector<64x1xi32>
    %c200_i32 = arith.constant 200 : i32
    %6 = vector.broadcast %c200_i32 : i32 to vector<64x1xi32>
    %7 = arith.cmpi slt, %5, %6 : vector<64x1xi32>
    %8 = tpu.iota {dimensions = array<i32: 1>} : vector<64x10xi32>
    %9 = vector.broadcast %1 : vector<64x1xi32> to vector<64x10xi32>
    %10 = arith.cmpi eq, %8, %9 : vector<64x10xi32>
    %cst = arith.constant dense<0xFF800000> : vector<64xf32>
    %11 = vector.multi_reduction <maximumf>, %0, %cst [1] : vector<64x10xf32> to vector<64xf32>
    %12 = vector.shape_cast %11 : vector<64xf32> to vector<64x1xf32>
    %13 = vector.broadcast %12 : vector<64x1xf32> to vector<64x10xf32>
    %14 = arith.subf %0, %13 : vector<64x10xf32>
    %15 = math.exp %14 : vector<64x10xf32>
    %cst_3 = arith.constant dense<0.000000e+00> : vector<64xf32>
    %16 = vector.multi_reduction <add>, %15, %cst_3 [1] : vector<64x10xf32> to vector<64xf32>
    %17 = vector.shape_cast %16 : vector<64xf32> to vector<64x1xf32>
    %18 = tpu.reciprocal %17 : vector<64x1xf32> -> vector<64x1xf32>
    %19 = vector.broadcast %18 : vector<64x1xf32> to vector<64x10xf32>
    %20 = arith.mulf %15, %19 : vector<64x10xf32>
    %cst_4 = arith.constant 1.000000e-07 : f32
    %cst_5 = arith.constant 1.000000e+00 : f32
    %21 = vector.broadcast %cst_4 : f32 to vector<64x10xf32>
    %22 = arith.maximumf %21, %20 : vector<64x10xf32>
    %23 = vector.broadcast %cst_5 : f32 to vector<64x10xf32>
    %24 = arith.minimumf %23, %22 : vector<64x10xf32>
    %25 = math.log %17 : vector<64x1xf32>
    %cst_6 = arith.constant 0.000000e+00 : f32
    %26 = vector.broadcast %cst_6 : f32 to vector<64x10xf32>
    %27 = arith.select %10, %14, %26 : vector<64x10xi1>, vector<64x10xf32>
    %cst_7 = arith.constant dense<0.000000e+00> : vector<64xf32>
    %28 = vector.multi_reduction <add>, %27, %cst_7 [1] : vector<64x10xf32> to vector<64xf32>
    %29 = vector.shape_cast %28 : vector<64xf32> to vector<64x1xf32>
    %30 = arith.subf %25, %29 : vector<64x1xf32>
    %cst_8 = arith.constant dense<0.000000e+00> : vector<64xf32>
    %31 = vector.multi_reduction <add>, %24, %cst_8 [1] : vector<64x10xf32> to vector<64xf32>
    %32 = vector.shape_cast %31 : vector<64xf32> to vector<64x1xf32>
    %cst_9 = arith.constant 0.000000e+00 : f32
    %33 = vector.broadcast %cst_9 : f32 to vector<64x10xf32>
    %34 = arith.select %10, %24, %33 : vector<64x10xi1>, vector<64x10xf32>
    %cst_10 = arith.constant dense<0.000000e+00> : vector<64xf32>
    %35 = vector.multi_reduction <add>, %34, %cst_10 [1] : vector<64x10xf32> to vector<64xf32>
    %36 = vector.shape_cast %35 : vector<64xf32> to vector<64x1xf32>
    %37 = arith.subf %32, %36 : vector<64x1xf32>
    %cst_11 = arith.constant 9.21034049 : f32
    %38 = vector.broadcast %cst_11 : f32 to vector<64x1xf32>
    %39 = arith.mulf %38, %37 : vector<64x1xf32>
    %cst_12 = arith.constant 0.000000e+00 : f32
    %40 = vector.broadcast %cst_12 : f32 to vector<64x1xf32>
    %41 = arith.select %7, %30, %40 : vector<64x1xi1>, vector<64x1xf32>
    %42 = vector.shape_cast %41 : vector<64x1xf32> to vector<1x64x1xf32>
    %cst_13 = arith.constant dense<0.000000e+00> : vector<1xf32>
    %43 = vector.multi_reduction <add>, %42, %cst_13 [1, 2] : vector<1x64x1xf32> to vector<1xf32>
    %44 = vector.shape_cast %43 : vector<1xf32> to vector<1x1x1xf32>
    %45 = vector.extract %44[0, 0, 0] : f32 from vector<1x1x1xf32>
    %cst_14 = arith.constant 0.000000e+00 : f32
    %46 = vector.broadcast %cst_14 : f32 to vector<64x1xf32>
    %47 = arith.select %7, %39, %46 : vector<64x1xi1>, vector<64x1xf32>
    %48 = vector.shape_cast %47 : vector<64x1xf32> to vector<1x64x1xf32>
    %cst_15 = arith.constant dense<0.000000e+00> : vector<1xf32>
    %49 = vector.multi_reduction <add>, %48, %cst_15 [1, 2] : vector<1x64x1xf32> to vector<1xf32>
    %50 = vector.shape_cast %49 : vector<1xf32> to vector<1x1x1xf32>
    %51 = vector.extract %50[0, 0, 0] : f32 from vector<1x1x1xf32>
    %52 = tpu.iota {dimensions = array<i32: 1>} : vector<8x128xi32>
    %c0_i32 = arith.constant 0 : i32
    %53 = vector.broadcast %c0_i32 : i32 to vector<8x128xi32>
    %54 = arith.cmpi eq, %52, %53 : vector<8x128xi32>
    %c1_i32 = arith.constant 1 : i32
    %55 = vector.broadcast %c1_i32 : i32 to vector<8x128xi32>
    %56 = arith.cmpi eq, %52, %55 : vector<8x128xi32>
    %cst_16 = arith.constant 0.000000e+00 : f32
    %57 = vector.broadcast %51 : f32 to vector<8x128xf32>
    %58 = vector.broadcast %cst_16 : f32 to vector<8x128xf32>
    %59 = arith.select %56, %57, %58 : vector<8x128xi1>, vector<8x128xf32>
    %60 = vector.broadcast %45 : f32 to vector<8x128xf32>
    %61 = arith.select %54, %60, %59 : vector<8x128xi1>, vector<8x128xf32>
    %c0_17 = arith.constant 0 : index
    %c0_18 = arith.constant 0 : index
    %c0_19 = arith.constant 0 : index
    %62 = vector.load %arg3[%c0_17, %c0_18, %c0_19] : memref<1x8x128xf32, #tpu.memory_space<vmem>>, vector<1x8x128xf32>
    %63 = vector.shape_cast %62 : vector<1x8x128xf32> to vector<8x128xf32>
    %64 = vector.shape_cast %61 : vector<8x128xf32> to vector<1x8x128xf32>
    tpu.vector_store %arg3[%c0_17, %c0_18, %c0_19], %64 {strides = array<i32>} : memref<1x8x128xf32, #tpu.memory_space<vmem>>, vector<1x8x128xf32>,
    return
  }
  func.func @transform_0(%arg0: i32) -> (i32, i32) {
    %c0_i32 = arith.constant 0 : i32
    %c0_i32_0 = arith.constant 0 : i32
    return %arg0, %c0_i32 : i32, i32
  }
  func.func @transform_1(%arg0: i32) -> (i32, i32) {
    %c0_i32 = arith.constant 0 : i32
    %c0_i32_0 = arith.constant 0 : i32
    return %arg0, %c0_i32 : i32, i32
  }
  func.func @transform_2(%arg0: i32) -> (i32, i32, i32) {
    %c0_i32 = arith.constant 0 : i32
    %c0_i32_0 = arith.constant 0 : i32
    %c0_i32_1 = arith.constant 0 : i32
    return %arg0, %c0_i32, %c0_i32_0 : i32, i32, i32
  }
}

</mosaic_0001>

<bundles_post_ra>
// kernel: tpu_custom_call.1
= control target key start
LH: loop header
LB: loop body
LE: loop exit
PB: predicated region body
PF: predicated region fallthrough
CT: control target
= control target key end

     0   :  { %7 = vsyncpa [#allocation3], 0  ;;  %s1401_s0 = inlined_call_operand.vmem [shape: f32[200,10], index: 0, kind: input, shape index: {}]   ;;  %s1402_s1 = inlined_call_operand.vmem [shape: s32[200,1], index: 1, kind: input, shape index: {}]   ;;  %s1403_s2 = inlined_call_operand.hbm [shape: f32[4,8,128], index: 2, kind: output, shape index: {}]  }
   0x1   :  { %9 = vsyncpa [#allocation3 + $0x1], 0  ;;  %s968_s9 = smov 0   ;;  %s970_s10 = smov 0  }
   0x2   :  { %s972_s11 = smov 0   ;;  %s974_s12 = smov 0  }
   0x3 LB: > { %s989_s13 = sadd.s32 4294967295, %s950_s12   ;;  %s779_s14 = sadd.s32 4294967294, %s950_s12   ;;  %s950_s12 = sphi %s974_s12, %s1415_s12   ;;  %s946_s11 = sphi %s972_s11, %s1414_s11   ;;  %s942_s10 = sphi %s970_s10, %s1413_s10   ;;  %s938_s9 = sphi %s968_s9, %s1412_s9  }
   0x4   : > { %s993_s15 = sadd.s32 1, %s950_s12   ;;  %s74_s16 = sadd.s32 1, %s946_s11 }
   0x5   : > { %s71_s17 = ssub.s32 %s950_s12, %s993_s15  ;;  %p84_p0 = scmp.ne.s32.totalorder %s946_s11, %s942_s10 }
   0x6   : > { %p72_p1 = scmp.eq.s32.totalorder %s71_s17, 0  ;;  %p85_p2 = scmp.eq.s32.totalorder %s989_s13, 3 }
   0x7   : > { %p90_p3 = scmp.ne.s32.totalorder %s942_s10, %s938_s9  ;;  %p91_p4 = scmp.eq.s32.totalorder %s779_s14, 3 }
   0x8   : > { %s1004_s18 = scalar_select %p72_p1, %s946_s11, %s74_s16  }
   0x9   : > { %p1006_p5 = por %p85_p2, %p84_p0  ;;  %p1010_p6 = por %p91_p4, %p90_p3 }
   0xa   : > { %p782_p7 = scmp.ge.s32.totalorder %s950_s12, 1  ;;  %p143_p8 = scmp.lt.s32.totalorder %s950_s12, 5 }
   0xc   : > { %p144_p9 = pnand %p782_p7, %p143_p8 }
   0xd   : > { %s1017_s21 = sshll.u32 (!%p144_p9), %s989_s13, 3  ;;  %s788_s30 = sshll.u32 (!%p144_p9), %s989_s13, 6 }
   0xe   : > { %147 = sbr.rel (%p144_p9) target bundleno = 672 (0x2a0), region = 28  ;;  %p183_p10 = scmp.lt.s32.totalorder (!%p144_p9), %s1017_s21, 24 }
   0xf   : > { %s175_s3 = sand.u32 (!%p144_p9), 1, %s942_s10   ;;  %s703_s7 = scalar_lea.hbm (!%p144_p9), %s1403_s2, %s1017_s21 }
  0x10   : > { %s783_s4 = sshll.u32 (!%p144_p9), %s175_s3, 3  ;;  %s707_s16 = sshll.u32 (!%p144_p9), %s703_s7, 4  ;;  %s708_s16 = int_to_ptr.hbm [resolvable:$true] %s707_s16 }
  0x11   : > { %s177_s8 = scalar_lea.vmem (!%p144_p9), [#allocation2], %s783_s4 }
  0x12   : > { %s705_s13 = sshll.u32 (!%p144_p9), %s177_s8, 4  ;;  %s706_s13 = int_to_ptr.vmem [resolvable:$true] %s705_s13 }
  0x13   : > { %v952_v0 = vmov 0   ;;  %s1021_s22 = scalar_select %p183_p10, %s1017_s21, 24  ;;  %vm283_vm0 = vcmask 80896  }
  0x14   : > { %838 = vset.pattern.permute.xlu2 %v952_v0  ;;  %837 = vset.pattern.permute.xlu1 %v952_v0 }
  0x15   : > { %839 = vset.pattern.permute.xlu0 %v952_v0  ;;  %s785_s23 = sshll.u32 %s1021_s22, 3  ;;  %s693_s22 = scalar_lea.sflag [#allocation3], %s175_s3 }
  0x16   : > { %s186_s26 = scalar_lea.vmem %s1401_s0, %s785_s23  ;;  %s1038_s29 = scalar_lea.vmem %s1402_s1, %s785_s23 }
  0x17   : > { %v210_v1 = vld [vmem:[%s186_s26 + $0x20] sm:$0xff]  ;;  %v208_v2 = vld [vmem:[%s186_s26 + $0x10] sm:$0xff]  ;;  %v211_v7 = vld [vmem:[%s186_s26 + $0x28] sm:$0xff]  ;;  %s902_s23 = sshra.s32 %s708_s16, 4  ;;  %s903_s23 = int_to_ptr.hbm [resolvable:$true] %s902_s23 }
  0x18   : > { %v206_v3 = vld [vmem:[%s186_s26] sm:$0xff]  ;;  %v296_v4 = vsel %vm283_vm0, %v210_v1, -inf  ;;  %v290_v5 = vsel %vm283_vm0, %v208_v2, -inf  ;;  %v209_v8 = vld [vmem:[%s186_s26 + $0x18] sm:$0xff]  ;;  %v207_v9 = vld [vmem:[%s186_s26 + $0x8] sm:$0xff]  ;;  %v299_v10 = vsel %vm283_vm0, %v211_v7, -inf  ;;  %p909_p0 = scmp.lt.s32.totalorder %s903_s23, %s1403_s2 }
  0x19   : > { %v284_v6 = vsel %vm283_vm0, %v206_v3, -inf  ;;  %297 = vmax.xlane.f32.xlu2 %v296_v4  ;;  %291 = vmax.xlane.f32.xlu1 %v290_v5  ;;  %v293_v11 = vsel %vm283_vm0, %v209_v8, -inf  ;;  %v287_v12 = vsel %vm283_vm0, %v207_v9, -inf  ;;  %v213_v13 = vld [vmem:[%s186_s26 + $0x38] sm:$0xff]  ;;  %v212_v14 = vld [vmem:[%s186_s26 + $0x30] sm:$0xff]  ;;  %v215_v17 = vld [vmem:[%s1038_s29 + $0x8] sm:$0xff] }
  0x1a   : > { %285 = vmax.xlane.f32.xlu0 %v284_v6  ;;  %v305_v15 = vsel %vm283_vm0, %v213_v13, -inf  ;;  %v302_v16 = vsel %vm283_vm0, %v212_v14, -inf  ;;  %v214_v18 = vld [vmem:[%s1038_s29] sm:$0xff]  ;;  %v217_v60 = vld [vmem:[%s1038_s29 + $0x18] sm:$0xff]  ;;  %v220_v61 = vld [vmem:[%s1038_s29 + $0x30] sm:$0xff]  ;;  %s904_s21 = scalar_lea.hbm %s903_s23, 8 }
  0x1b   : > { %v218_v59 = vld [vmem:[%s1038_s29 + $0x20] sm:$0xff]  ;;  %v216_v62 = vld [vmem:[%s1038_s29 + $0x10] sm:$0xff]  ;;  %v219_v63 = vld [vmem:[%s1038_s29 + $0x28] sm:$0xff]  ;;  %p905_p11 = scmp.ne.s32.totalorder %s903_s23, %s904_s21  ;;  %s908_s26 = scalar_lea.hbm %s1403_s2, 32 }
  0x1c   : > { %v221_v0 = vld [vmem:[%s1038_s29 + $0x38] sm:$0xff]  ;;  %p910_p1 = scmp.lt.s32.totalorder %s908_s26, %s904_s21 }
  0x1d   : > { %p906_p12 = pnand %p905_p11, %p1006_p5 }
  0x1e   : > { %p911_p2 = por %p910_p1, %p909_p0 }
  0x1f   : > { %p907_p13 = pneg %p906_p12 }
  0x21   : > { %300 = vmax.xlane.f32.xlu2 %v299_v10  ;;  %294 = vmax.xlane.f32.xlu1 %v293_v11  ;;  %p912_p3 = pnand %p911_p2, %p907_p13 }
  0x22   : > { %288 = vmax.xlane.f32.xlu0 %v287_v12 }
  0x29   : > { %306 = vmax.xlane.f32.xlu1 %v305_v15 }
  0x2a   : > { %303 = vmax.xlane.f32.xlu0 %v302_v16 }
  0x39   : > { %255 = vperm.xlu2 %838, %v215_v17  }
  0x42   : > { %252 = vperm.xlu1 %837, %v214_v18  }
  0x8c   : > { %v298_v19 = vpop.xlane.xlu2 %297  ;;  %v292_v20 = vpop.xlane.xlu1 %291 }
  0x8d   : > { %v1042_v21 = vsub.f32 %v208_v2, %v292_v20  ;;  %v286_v22 = vpop.xlane.xlu0 %285  ;;  %v1052_v32 = vsub.f32 %v210_v1, %v298_v19  ;;  %v222_v1 = vlaneseq }
  0x8e   : > { %v1044_v23 = vsub.f32 %v206_v3, %v286_v22 }
  0x8f   : > { %v320_v24 = vmul.f32 1.442695, %v1042_v21  ;;  %v324_v40 = vmul.f32 1.442695, %v1052_v32  ;;  %v1102_v2 = vand.u32 127, %v222_v1 }
  0x90   : > { %v316_v25 = vmul.f32 1.442695, %v1044_v23 }
  0x91   : > { %840 = vpow2.f32 %v320_v24 }
  0x92   : > { %842 = vpow2.f32 %v316_v25 }
  0x94   : > { %v301_v26 = vpop.xlane.xlu2 %300  ;;  %v295_v27 = vpop.xlane.xlu1 %294 }
  0x95   : > { %v1048_v28 = vsub.f32 %v211_v7, %v301_v26  ;;  %v1050_v29 = vsub.f32 %v209_v8, %v295_v27  ;;  %v289_v30 = vpop.xlane.xlu0 %288 }
  0x96   : > { %v309_v31 = vsub.f32 %v207_v9, %v289_v30 }
  0x97   : > { %v326_v33 = vmul.f32 1.442695, %v1048_v28  ;;  %v322_v34 = vmul.f32 1.442695, %v1050_v29  ;;  %v1056_v35 = vpop.eup %840 }
  0x98   : > { %v318_v36 = vmul.f32 1.442695, %v309_v31  ;;  %v1058_v37 = vpop.eup %842  ;;  %v338_v38 = vsel %vm283_vm0, %v1056_v35, 0.0 }
  0x99   : > { %844 = vpow2.f32 %v326_v33  ;;  %339 = vadd.xlane.f32.xlu1 %v338_v38  ;;  %v332_v39 = vsel %vm283_vm0, %v1058_v37, 0.0 }
  0x9a   : > { %846 = vpow2.f32 %v322_v34  ;;  %333 = vadd.xlane.f32.xlu2 %v332_v39 }
  0x9b   : > { %848 = vpow2.f32 %v318_v36 }
  0x9c   : > { %v307_v41 = vpop.xlane.xlu1 %306  ;;  %850 = vpow2.f32 %v324_v40  ;;  %v1104_v3 = vpop.permute.xlu2 %255 }
  0x9d   : > { %v304_v42 = vpop.xlane.xlu0 %303  ;;  %v1069_v45 = vsub.f32 %v213_v13, %v307_v41  ;;  %vm276_vm1 = vcmp.eq.s32.totalorder %v1102_v2, %v1104_v3 }
  0x9e   : > { %v1065_v43 = vsub.f32 %v212_v14, %v304_v42  ;;  %v509_v4 = vsel %vm276_vm1, %v309_v31, 0.0 }
  0x9f   : > { %v1067_v44 = vpop.eup %844  ;;  %v330_v52 = vmul.f32 1.442695, %v1069_v45  ;;  %v519_v5 = vsel %vm283_vm0, %v509_v4, 0.0 }
  0xa0   : > { %v1071_v46 = vpop.eup %846  ;;  %v328_v47 = vmul.f32 1.442695, %v1065_v43  ;;  %v347_v48 = vsel %vm283_vm0, %v1067_v44, 0.0 }
  0xa1   : > { %v1076_v49 = vpop.eup %848  ;;  %v341_v50 = vsel %vm283_vm0, %v1071_v46, 0.0  ;;  %348 = vadd.xlane.f32.xlu1 %v347_v48 }
  0xa2   : > { %852 = vpow2.f32 %v328_v47  ;;  %v335_v51 = vsel %vm283_vm0, %v1076_v49, 0.0  ;;  %342 = vadd.xlane.f32.xlu2 %v341_v50  ;;  %v1083_v53 = vpop.eup %850 }
  0xa3   : > { %336 = vadd.xlane.f32.xlu0 %v335_v51  ;;  %854 = vpow2.f32 %v330_v52  ;;  %v344_v55 = vsel %vm283_vm0, %v1083_v53, 0.0 }
  0xa8   : > { %v1085_v54 = vpop.eup %852 }
  0xa9   : > { %v350_v56 = vsel %vm283_vm0, %v1085_v54, 0.0  ;;  %v1091_v57 = vpop.eup %854 }
  0xaa   : > { %351 = vadd.xlane.f32.xlu2 %v350_v56  ;;  %v353_v58 = vsel %vm283_vm0, %v1091_v57, 0.0 }
  0xab   : > { %345 = vadd.xlane.f32.xlu0 %v344_v55 }
  0xb3   : > { %354 = vadd.xlane.f32.xlu0 %v353_v58 }
  0xb4   : > { %v1112_v6 = vpop.permute.xlu1 %252 }
  0xb5   : > { %vm275_vm2 = vcmp.eq.s32.totalorder %v1102_v2, %v1112_v6 }
  0xb6   : > { %v508_v7 = vsel %vm275_vm2, %v1044_v23, 0.0 }
  0xb7   : > { %v516_v8 = vsel %vm283_vm0, %v508_v7, 0.0 }
  0xba   : > { %264 = vperm.xlu1 %837, %v218_v59  }
  0xc2   : > { %261 = vperm.xlu2 %838, %v217_v60   ;;  %270 = vperm.xlu1 %837, %v220_v61  }
  0xc7   : > { %258 = vperm.xlu0 %839, %v216_v62  }
  0xca   : > { %267 = vperm.xlu2 %838, %v219_v63  }
  0xd2   : > { %273 = vperm.xlu2 %838, %v221_v0  }
  0xf1   : > { %520 = vadd.xlane.f32.xlu0 %v519_v5 }
  0xfb   : > { %517 = vadd.xlane.f32.xlu2 %v516_v8 }
 0x10c   : > { %v1121_v9 = vpop.xlane.xlu1 %339 }
 0x10d   : > { %856 = vrcp.f32 %v1121_v9  ;;  %v1124_v10 = vpop.xlane.xlu2 %333  ;;  %vm389_vm3 = vweird.f32 %v1121_v9  ;;  %v395_v23 = vand.u32 2147483648, %v1121_v9  ;;  %v393_v26 = vand.u32 2147483647, %v1121_v9 }
 0x10e   : > { %858 = vrcp.f32 %v1124_v10  ;;  %v367_v20 = vand.u32 2147483648, %v1124_v10  ;;  %v365_v25 = vand.u32 2147483647, %v1124_v10  ;;  %vm361_vm6 = vweird.f32 %v1124_v10 }
 0x10f   : > { %v396_v36 = vor.u32 1.1754944e-38, %v395_v23  ;;  %vm394_vm10 = vcmp.eq.f32.partialorder %v393_v26, 8.507059e+37 }
 0x110   : > { %v368_v33 = vor.u32 1.1754944e-38, %v367_v20  ;;  %vm366_vm9 = vcmp.eq.f32.partialorder %v365_v25, 8.507059e+37 }
 0x113   : > { %v857_v11 = vpop.eup %856 }
 0x114   : > { %v859_v12 = vpop.eup %858  ;;  %v385_v13 = vmul.f32 %v857_v11, %v1121_v9  ;;  %v1134_v19 = vpop.xlane.xlu1 %348  ;;  %vm390_vm4 = vweird.f32 %v857_v11 }
 0x115   : > { %v357_v14 = vmul.f32 %v859_v12, %v1124_v10  ;;  %v1129_v15 = vpop.xlane.xlu2 %342  ;;  %vm362_vm5 = vweird.f32 %v859_v12  ;;  %vm391_vm7 = vmor %vm389_vm3, %vm390_vm4  ;;  %vm431_vm3 = vweird.f32 %v1134_v19 }
 0x116   : > { %v1131_v16 = vpop.xlane.xlu0 %336  ;;  %v386_v17 = vsub.f32 1.0, %v385_v13  ;;  %860 = vrcp.f32 %v1129_v15  ;;  %vm363_vm8 = vmor %vm361_vm6, %vm362_vm5  ;;  %vm403_vm11 = vweird.f32 %v1129_v15  ;;  %v407_v56 = vand.u32 2147483647, %v1129_v15 }
 0x117   : > { %v358_v18 = vsub.f32 1.0, %v357_v14  ;;  %862 = vrcp.f32 %v1134_v19  ;;  %v409_v58 = vand.u32 2147483648, %v1129_v15 }
 0x118   : > { %v387_v22 = vmul.f32 %v857_v11, %v386_v17  ;;  %864 = vrcp.f32 %v1131_v16  ;;  %vm408_vm14 = vcmp.eq.f32.partialorder %v407_v56, 8.507059e+37 }
 0x119   : > { %v359_v24 = vmul.f32 %v859_v12, %v358_v18  ;;  %v410_v8 = vor.u32 1.1754944e-38, %v409_v58 }
 0x11a   : > { %v388_v27 = vadd.f32 %v857_v11, %v387_v22 }
 0x11b   : > { %v360_v30 = vadd.f32 %v859_v12, %v359_v24 }
 0x11c   : > { %v861_v31 = vpop.eup %860  ;;  %v392_v34 = vsel %vm391_vm7, %v857_v11, %v388_v27 }
 0x11d   : > { %v399_v38 = vmul.f32 %v861_v31, %v1129_v15  ;;  %v364_v40 = vsel %vm363_vm8, %v859_v12, %v360_v30  ;;  %v397_v42 = vsel %vm394_vm10, %v396_v36, %v392_v34  ;;  %v1149_v50 = vpop.eup %862  ;;  %vm404_vm12 = vweird.f32 %v861_v31  ;;  %v1163_v4 = vpop.xlane.xlu2 %351 }
 0x11e   : > { %v1144_v39 = vpop.xlane.xlu0 %345  ;;  %v369_v41 = vsel %vm366_vm9, %v368_v33, %v364_v40  ;;  %v470_v52 = vmul.f32 %v1056_v35, %v397_v42  ;;  %v427_v59 = vmul.f32 %v1149_v50, %v1134_v19  ;;  %v1157_v62 = vpop.eup %864  ;;  %vm405_vm13 = vmor %vm403_vm11, %vm404_vm12  ;;  %vm432_vm5 = vweird.f32 %v1149_v50 }
 0x11f   : > { %v400_v47 = vsub.f32 1.0, %v399_v38  ;;  %866 = vrcp.f32 %v1144_v39  ;;  %v468_v48 = vmul.f32 %v1058_v37, %v369_v41  ;;  %v371_v6 = vmul.f32 %v1157_v62, %v1131_v16  ;;  %vm1189_vm7 = vmor %vm431_vm3, %vm432_vm5 }
 0x120   : > { %v478_v0 = vmax.f32 %v470_v52, 1e-07  ;;  %v428_v11 = vsub.f32 1.0, %v427_v59  ;;  %868 = vrcp.f32 %v1163_v4  ;;  %v423_v20 = vand.u32 2147483648, %v1144_v39 }
 0x121   : > { %v476_v51 = vmax.f32 %v468_v48, 1e-07  ;;  %v401_v55 = vmul.f32 %v861_v31, %v400_v47  ;;  %v421_v23 = vand.u32 2147483647, %v1144_v39  ;;  %v372_v25 = vsub.f32 1.0, %v371_v6 }
 0x122   : > { %v486_v17 = vmin.f32 %v478_v0, 1.0  ;;  %v429_v24 = vmul.f32 %v1149_v50, %v428_v11  ;;  %v437_v33 = vand.u32 2147483648, %v1134_v19  ;;  %v435_v41 = vand.u32 2147483647, %v1134_v19 }
 0x123   : > { %v484_v60 = vmin.f32 %v476_v51, 1.0  ;;  %v402_v61 = vadd.f32 %v861_v31, %v401_v55  ;;  %vm422_vm6 = vcmp.eq.f32.partialorder %v421_v23, 8.507059e+37  ;;  %v373_v47 = vmul.f32 %v1157_v62, %v372_v25 }
 0x124   : > { %v554_v27 = vsel %vm283_vm0, %v486_v17, 0.0  ;;  %v430_v40 = vadd.f32 %v1149_v50, %v429_v24  ;;  %v438_v55 = vor.u32 1.1754944e-38, %v437_v33  ;;  %vm436_vm8 = vcmp.eq.f32.partialorder %v435_v41, 8.507059e+37 }
 0x125   : > { %v867_v37 = vpop.eup %866  ;;  %v548_v63 = vsel %vm283_vm0, %v484_v60, 0.0  ;;  %v572_v35 = vsel %vm275_vm2, %v484_v60, 0.0  ;;  %v406_v12 = vsel %vm405_vm13, %v861_v31, %v402_v61  ;;  %vm417_vm2 = vweird.f32 %v1144_v39 }
 0x126   : > { %v413_v5 = vmul.f32 %v867_v37, %v1144_v39  ;;  %549 = vadd.xlane.f32.xlu1 %v548_v63  ;;  %v580_v7 = vsel %vm283_vm0, %v572_v35, 0.0  ;;  %v411_v14 = vsel %vm408_vm14, %v410_v8, %v406_v12  ;;  %vm418_vm15 = vweird.f32 %v867_v37  ;;  %v1181_v34 = vpop.eup %868  ;;  %v1183_v36 = vpop.xlane.xlu0 %354 }
 0x127   : > { %581 = vadd.xlane.f32.xlu2 %v580_v7  ;;  %v471_v18 = vmul.f32 %v1071_v46, %v411_v14  ;;  %vm419_vm4 = vmor %vm417_vm2, %vm418_vm15  ;;  %v424_v31 = vor.u32 1.1754944e-38, %v423_v20  ;;  %v441_v52 = vmul.f32 %v1181_v34, %v1163_v4  ;;  %870 = vrcp.f32 %v1183_v36  ;;  %v262_v7 = vpop.permute.xlu2 %261 }
 0x128   : > { %v414_v13 = vsub.f32 1.0, %v413_v5  ;;  %v434_v56 = vsel %vm1189_vm7, %v1149_v50, %v430_v40  ;;  %v374_v58 = vadd.f32 %v1157_v62, %v373_v47  ;;  %vm376_vm9 = vweird.f32 %v1157_v62 }
 0x129   : > { %v479_v30 = vmax.f32 %v471_v18, 1e-07  ;;  %v442_v61 = vsub.f32 1.0, %v441_v52  ;;  %vm375_vm10 = vweird.f32 %v1131_v16  ;;  %v379_v63 = vand.u32 2147483647, %v1131_v16 }
 0x12a   : > { %v415_v22 = vmul.f32 %v867_v37, %v414_v13  ;;  %vm1207_vm11 = vmor %vm375_vm10, %vm376_vm9  ;;  %vm278_vm14 = vcmp.eq.s32.totalorder %v1102_v2, %v262_v7  ;;  %vm445_vm15 = vweird.f32 %v1163_v4  ;;  %vm446_vm2 = vweird.f32 %v1181_v34 }
 0x12b   : > { %v487_v48 = vmin.f32 %v479_v30, 1.0  ;;  %v378_v5 = vsel %vm1207_vm11, %v1157_v62, %v374_v58  ;;  %vm380_vm13 = vcmp.eq.f32.partialorder %v379_v63, 8.507059e+37  ;;  %v443_v14 = vmul.f32 %v1181_v34, %v442_v61  ;;  %vm1233_vm3 = vmor %vm445_vm15, %vm446_vm2 }
 0x12c   : > { %v416_v26 = vadd.f32 %v867_v37, %v415_v22  ;;  %v451_v23 = vand.u32 2147483648, %v1163_v4  ;;  %v511_v25 = vsel %vm278_vm14, %v1050_v29, 0.0  ;;  %v265_v33 = vpop.permute.xlu1 %264  ;;  %vm459_vm7 = vweird.f32 %v1183_v36 }
 0x12d   : > { %v557_v59 = vsel %vm283_vm0, %v487_v48, 0.0  ;;  %v1211_v50 = vpop.eup %870  ;;  %v575_v30 = vsel %vm278_vm14, %v487_v48, 0.0  ;;  %vm279_vm5 = vcmp.eq.s32.totalorder %v1102_v2, %v265_v33  ;;  %872 = vlog2.f32 %v1131_v16 }
 0x12e   : > { %555 = vadd.xlane.f32.xlu1 %v554_v27  ;;  %v420_v46 = vsel %vm419_vm4, %v867_v37, %v416_v26  ;;  %v439_v37 = vsel %vm436_vm8, %v438_v55, %v434_v56  ;;  %v455_v18 = vmul.f32 %v1211_v50, %v1183_v36  ;;  %v444_v26 = vadd.f32 %v1181_v34, %v443_v14 }
 0x12f   : > { %v425_v38 = vsel %vm422_vm6, %v424_v31, %v420_v46  ;;  %v473_v11 = vmul.f32 %v1067_v44, %v439_v37  ;;  %v449_v27 = vand.u32 2147483647, %v1163_v4  ;;  %v589_v41 = vsel %vm283_vm0, %v575_v30, 0.0 }
 0x130   : > { %v472_v51 = vmul.f32 %v1083_v53, %v425_v38  ;;  %v381_v53 = vand.u32 2147483648, %v1131_v16  ;;  %v456_v24 = vsub.f32 1.0, %v455_v18  ;;  %v525_v38 = vsel %vm283_vm0, %v511_v25, 0.0 }
 0x131   : > { %v448_v29 = vsel %vm1233_vm3, %v1181_v34, %v444_v26  ;;  %vm450_vm4 = vcmp.eq.f32.partialorder %v449_v27, 8.507059e+37  ;;  %vm460_vm6 = vweird.f32 %v1211_v50  ;;  %v512_v56 = vsel %vm279_vm5, %v1052_v32, 0.0 }
 0x132   : > { %v480_v60 = vmax.f32 %v472_v51, 1e-07  ;;  %v382_v12 = vor.u32 1.1754944e-38, %v381_v53  ;;  %v457_v42 = vmul.f32 %v1211_v50, %v456_v24  ;;  %v465_v34 = vand.u32 2147483648, %v1183_v36  ;;  %vm461_vm8 = vmor %vm459_vm7, %vm460_vm6 }
 0x133   : > { %v528_v37 = vsel %vm283_vm0, %v512_v56, 0.0  ;;  %874 = vlog2.f32 %v1124_v10  ;;  %v873_v16 = vpop.eup %872  ;;  %vm628_vm14 = vcmask 7168   ;;  %vm686_vm6 = vcmp.eq.s32.totalorder %v1102_v2, 1 }
 0x134   : > { %v488_v8 = vmin.f32 %v480_v60, 1.0  ;;  %v383_v22 = vsel %vm380_vm13, %v382_v12, %v378_v5  ;;  %v458_v52 = vadd.f32 %v1211_v50, %v457_v42  ;;  %v268_v60 = vpop.permute.xlu2 %267  ;;  %v466_v63 = vor.u32 1.1754944e-38, %v465_v34 }
 0x135   : > { %vm280_vm9 = vcmp.eq.s32.totalorder %v1102_v2, %v268_v60  ;;  %v495_v27 = vmul.f32 0.6931472, %v873_v16  ;;  %876 = vlog2.f32 %v1121_v9  ;;  %vm685_vm7 = vcmp.eq.s32.totalorder %v1102_v2, 0 }
 0x136   : > { %558 = vadd.xlane.f32.xlu1 %v557_v59  ;;  %v560_v44 = vsel %vm283_vm0, %v488_v8, 0.0  ;;  %v576_v55 = vsel %vm279_vm5, %v488_v8, 0.0  ;;  %v463_v59 = vand.u32 2147483647, %v1183_v36  ;;  %v462_v32 = vsel %vm461_vm8, %v1211_v50, %v458_v52 }
 0x137   : > { %v592_v61 = vsel %vm283_vm0, %v576_v55, 0.0  ;;  %v513_v5 = vsel %vm280_vm9, %v1048_v28, 0.0  ;;  %878 = vlog2.f32 %v1129_v15 }
 0x138   : > { %vm464_vm10 = vcmp.eq.f32.partialorder %v463_v59, 8.507059e+37  ;;  %v531_v12 = vsel %vm283_vm0, %v513_v5, 0.0  ;;  %880 = vlog2.f32 %v1144_v39 }
 0x139   : > { %v259_v0 = vpop.permute.xlu0 %258  ;;  %v875_v30 = vpop.eup %874  ;;  %882 = vlog2.f32 %v1134_v19 }
 0x13a   : > { %vm277_vm12 = vcmp.eq.s32.totalorder %v1102_v2, %v259_v0  ;;  %v467_v0 = vsel %vm464_vm10, %v466_v63, %v462_v32  ;;  %v493_v33 = vmul.f32 0.6931472, %v875_v30  ;;  %884 = vlog2.f32 %v1163_v4 }
 0x13b   : > { %v574_v6 = vsel %vm277_vm12, %v486_v17, 0.0  ;;  %v510_v13 = vsel %vm277_vm12, %v1042_v21, 0.0  ;;  %v481_v17 = vmax.f32 %v473_v11, 1e-07  ;;  %v469_v21 = vmul.f32 %v1076_v49, %v383_v22  ;;  %v271_v11 = vpop.permute.xlu1 %270  ;;  %v877_v56 = vpop.eup %876 }
 0x13c   : > { %v586_v20 = vsel %vm283_vm0, %v574_v6, 0.0  ;;  %v522_v62 = vsel %vm283_vm0, %v510_v13, 0.0  ;;  %v452_v49 = vor.u32 1.1754944e-38, %v451_v23  ;;  %v475_v8 = vmul.f32 %v1091_v57, %v467_v0 }
 0x13d   : > { %587 = vadd.xlane.f32.xlu2 %v586_v20  ;;  %523 = vadd.xlane.f32.xlu0 %v522_v62  ;;  %v489_v46 = vmin.f32 %v481_v17, 1.0  ;;  %v477_v40 = vmax.f32 %v469_v21, 1e-07  ;;  %v274_v20 = vpop.permute.xlu2 %273  ;;  %v1273_v22 = vshrl.u32 %v222_v1, 7  ;;  %v1286_v1 = vstv %s788_s30  ;;  %v879_v32 = vpop.eup %878 }
 0x13e   : > { %561 = vadd.xlane.f32.xlu1 %v560_v44  ;;  %v453_v51 = vsel %vm450_vm4, %v452_v49, %v448_v29  ;;  %v483_v13 = vmax.f32 %v475_v8, 1e-07  ;;  %vm282_vm11 = vcmp.eq.s32.totalorder %v1102_v2, %v274_v20  ;;  %v499_v15 = vmul.f32 0.6931472, %v879_v32 }
 0x13f   : > { %v563_v47 = vsel %vm283_vm0, %v489_v46, 0.0  ;;  %v485_v48 = vmin.f32 %v477_v40, 1.0  ;;  %v474_v58 = vmul.f32 %v1085_v54, %v453_v51  ;;  %v577_v3 = vsel %vm280_vm9, %v489_v46, 0.0 }
 0x140   : > { %v595_v50 = vsel %vm283_vm0, %v577_v3, 0.0  ;;  %v491_v14 = vmin.f32 %v483_v13, 1.0  ;;  %v224_v24 = vadd.s32 8, %v1273_v22  ;;  %v1296_v31 = vadd.s32 %v1286_v1, %v1273_v22 }
 0x141   : > { %v573_v53 = vsel %vm276_vm1, %v485_v48, 0.0  ;;  %v482_v35 = vmax.f32 %v474_v58, 1e-07  ;;  %vm281_vm1 = vcmp.eq.s32.totalorder %v1102_v2, %v271_v11  ;;  %v551_v18 = vsel %vm283_vm0, %v485_v48, 0.0 }
 0x142   : > { %v583_v54 = vsel %vm283_vm0, %v573_v53, 0.0  ;;  %v569_v62 = vsel %vm283_vm0, %v491_v14, 0.0  ;;  %v579_v44 = vsel %vm282_vm11, %v491_v14, 0.0  ;;  %v514_v17 = vsel %vm281_vm1, %v1065_v43, 0.0 }
 0x143   : > { %v490_v7 = vmin.f32 %v482_v35, 1.0  ;;  %v601_v21 = vsel %vm283_vm0, %v579_v44, 0.0  ;;  %v534_v23 = vsel %vm283_vm0, %v514_v17, 0.0  ;;  %v1289_v25 = vadd.s32 %v1286_v1, %v224_v24 }
 0x144   : > { %v515_v43 = vsel %vm282_vm11, %v1069_v45, 0.0  ;;  %vm241_vm13 = vcmp.lt.s32.totalorder %v1296_v31, 200  ;;  %v225_v52 = vadd.s32 16, %v1273_v22  ;;  %v497_v58 = vmul.f32 0.6931472, %v877_v56 }
 0x145   : > { %590 = vadd.xlane.f32.xlu2 %v589_v41  ;;  %526 = vadd.xlane.f32.xlu0 %v525_v38  ;;  %v566_v6 = vsel %vm283_vm0, %v490_v7, 0.0  ;;  %v578_v28 = vsel %vm281_vm1, %v490_v7, 0.0  ;;  %v537_v10 = vsel %vm283_vm0, %v515_v43, 0.0  ;;  %vm242_vm12 = vcmp.lt.s32.totalorder %v1289_v25, 200 }
 0x146   : > { %564 = vadd.xlane.f32.xlu1 %v563_v47  ;;  %v598_v57 = vsel %vm283_vm0, %v578_v28, 0.0  ;;  %v1314_v34 = vadd.s32 %v1286_v1, %v225_v52  ;;  %v226_v53 = vadd.s32 24, %v1273_v22  ;;  %v227_v5 = vadd.s32 32, %v1273_v22 }
 0x147   : > { %v230_v4 = vadd.s32 56, %v1273_v22  ;;  %886 = vlog2.f32 %v1183_v36 }
 0x148   : > { %vm243_vm0 = vcmp.lt.s32.totalorder %v1314_v34, 200 }
 0x14d   : > { %593 = vadd.xlane.f32.xlu2 %v592_v61  ;;  %529 = vadd.xlane.f32.xlu0 %v528_v37 }
 0x14e   : > { %584 = vadd.xlane.f32.xlu1 %v583_v54  ;;  %v1323_v54 = vadd.s32 %v1286_v1, %v226_v53 }
 0x150   : > { %vm244_vm15 = vcmp.lt.s32.totalorder %v1323_v54, 200 }
 0x155   : > { %596 = vadd.xlane.f32.xlu2 %v595_v50  ;;  %532 = vadd.xlane.f32.xlu0 %v531_v12  ;;  %v881_v50 = vpop.eup %880 }
 0x156   : > { %567 = vadd.xlane.f32.xlu1 %v566_v6  ;;  %v237_v6 = vadd.s32 %v1286_v1, %v227_v5  ;;  %v501_v39 = vmul.f32 0.6931472, %v881_v50  ;;  %v883_v44 = vpop.eup %882 }
 0x157   : > { %v503_v24 = vmul.f32 0.6931472, %v883_v44 }
 0x158   : > { %vm245_vm2 = vcmp.lt.s32.totalorder %v237_v6, 200 }
 0x15d   : > { %599 = vadd.xlane.f32.xlu2 %v598_v57  ;;  %552 = vadd.xlane.f32.xlu0 %v551_v18  ;;  %v228_v57 = vadd.s32 40, %v1273_v22 }
 0x15e   : > { %570 = vadd.xlane.f32.xlu1 %v569_v62 }
 0x164   : > { %v521_v26 = vpop.xlane.xlu0 %520 }
 0x165   : > { %602 = vadd.xlane.f32.xlu2 %v601_v21  ;;  %535 = vadd.xlane.f32.xlu0 %v534_v23  ;;  %v541_v46 = vsub.f32 %v495_v27, %v521_v26  ;;  %v238_v21 = vadd.s32 %v1286_v1, %v228_v57 }
 0x167   : > { %v621_v45 = vsel %vm242_vm12, %v541_v46, 0.0  ;;  %vm246_vm3 = vcmp.lt.s32.totalorder %v238_v21, 200 }
 0x168   : > { %v630_v41 = vsel %vm628_vm14, %v621_v45, 0.0 }
 0x16d   : > { %538 = vadd.xlane.f32.xlu0 %v537_v10 }
 0x16e   : > { %v518_v38 = vpop.xlane.xlu2 %517 }
 0x16f   : > { %v540_v40 = vsub.f32 %v493_v33, %v518_v38 }
 0x171   : > { %v620_v49 = vsel %vm241_vm13, %v540_v40, 0.0 }
 0x172   : > { %v629_v29 = vsel %vm628_vm14, %v620_v49, 0.0 }
 0x173   : > { %v631_v42 = vadd.f32 %v630_v41, %v629_v29 }
 0x199   : > { %v550_v47 = vpop.xlane.xlu1 %549 }
 0x19a   : > { %v582_v51 = vpop.xlane.xlu2 %581 }
 0x19b   : > { %v604_v43 = vsub.f32 %v550_v47, %v582_v51  ;;  %v229_v47 = vadd.s32 48, %v1273_v22 }
 0x19d   : > { %v612_v38 = vmul.f32 9.2103405, %v604_v43 }
 0x19f   : > { %v653_v51 = vsel %vm241_vm13, %v612_v38, 0.0 }
 0x1a1   : > { %v1307_v48 = vpop.xlane.xlu1 %555 }
 0x1a9   : > { %v1311_v55 = vpop.xlane.xlu1 %558 }
 0x1b0   : > { %v588_v59 = vpop.xlane.xlu2 %587  ;;  %v524_v60 = vpop.xlane.xlu0 %523 }
 0x1b1   : > { %v542_v61 = vsub.f32 %v497_v58, %v524_v60  ;;  %v562_v9 = vpop.xlane.xlu1 %561  ;;  %v606_v46 = vsub.f32 %v1307_v48, %v588_v59  ;;  %v885_v58 = vpop.eup %884 }
 0x1b2   : > { %v505_v34 = vmul.f32 0.6931472, %v885_v58 }
 0x1b3   : > { %v622_v37 = vsel %vm243_vm0, %v542_v61, 0.0  ;;  %v614_v29 = vmul.f32 9.2103405, %v606_v46  ;;  %v661_v61 = vsel %vm628_vm14, %v653_v51, 0.0 }
 0x1b4   : > { %v632_v63 = vsel %vm628_vm14, %v622_v37, 0.0 }
 0x1b5   : > { %v633_v35 = vadd.f32 %v632_v63, %v631_v42 }
 0x1b8   : > { %v591_v0 = vpop.xlane.xlu2 %590  ;;  %v527_v3 = vpop.xlane.xlu0 %526 }
 0x1b9   : > { %v543_v7 = vsub.f32 %v499_v15, %v527_v3  ;;  %v565_v8 = vpop.xlane.xlu1 %564  ;;  %v607_v45 = vsub.f32 %v1311_v55, %v591_v0  ;;  %v655_v55 = vsel %vm243_vm0, %v614_v29, 0.0  ;;  %v240_v15 = vadd.s32 %v1286_v1, %v230_v4 }
 0x1bb   : > { %v623_v11 = vsel %vm244_vm15, %v543_v7, 0.0  ;;  %v615_v52 = vmul.f32 9.2103405, %v607_v45  ;;  %vm248_vm5 = vcmp.lt.s32.totalorder %v240_v15, 200 }
 0x1bc   : > { %v634_v12 = vsel %vm628_vm14, %v623_v11, 0.0 }
 0x1bd   : > { %v635_v13 = vadd.f32 %v634_v12, %v633_v35  ;;  %v656_v37 = vsel %vm244_vm15, %v615_v52, 0.0  ;;  %v664_v35 = vsel %vm628_vm14, %v655_v55, 0.0 }
 0x1be   : > { %v666_v36 = vsel %vm628_vm14, %v656_v37, 0.0 }
 0x1c0   : > { %v594_v28 = vpop.xlane.xlu2 %593  ;;  %v530_v14 = vpop.xlane.xlu0 %529 }
 0x1c1   : > { %v544_v18 = vsub.f32 %v501_v39, %v530_v14  ;;  %v585_v62 = vpop.xlane.xlu1 %584  ;;  %v608_v40 = vsub.f32 %v562_v9, %v594_v28  ;;  %v239_v9 = vadd.s32 %v1286_v1, %v229_v47  ;;  %v887_v39 = vpop.eup %886 }
 0x1c3   : > { %v624_v20 = vsel %vm245_vm2, %v544_v18, 0.0  ;;  %v616_v59 = vmul.f32 9.2103405, %v608_v40  ;;  %vm247_vm4 = vcmp.lt.s32.totalorder %v239_v9, 200 }
 0x1c4   : > { %v636_v17 = vsel %vm628_vm14, %v624_v20, 0.0 }
 0x1c5   : > { %v637_v23 = vadd.f32 %v636_v17, %v635_v13  ;;  %v657_v25 = vsel %vm245_vm2, %v616_v59, 0.0 }
 0x1c6   : > { %v668_v6 = vsel %vm628_vm14, %v657_v25, 0.0 }
 0x1c8   : > { %v597_v16 = vpop.xlane.xlu2 %596  ;;  %v533_v19 = vpop.xlane.xlu0 %532 }
 0x1c9   : > { %v545_v26 = vsub.f32 %v503_v24, %v533_v19  ;;  %v568_v33 = vpop.xlane.xlu1 %567  ;;  %v609_v56 = vsub.f32 %v565_v8, %v597_v16 }
 0x1cb   : > { %v625_v27 = vsel %vm246_vm3, %v545_v26, 0.0  ;;  %v617_v32 = vmul.f32 9.2103405, %v609_v56 }
 0x1cc   : > { %v638_v30 = vsel %vm628_vm14, %v625_v27, 0.0 }
 0x1cd   : > { %v639_v10 = vadd.f32 %v638_v30, %v637_v23  ;;  %v658_v54 = vsel %vm246_vm3, %v617_v32, 0.0 }
 0x1ce   : > { %v670_v18 = vsel %vm628_vm14, %v658_v54, 0.0 }
 0x1d0   : > { %v600_v49 = vpop.xlane.xlu2 %599  ;;  %v553_v41 = vpop.xlane.xlu0 %552 }
 0x1d1   : > { %v605_v42 = vsub.f32 %v553_v41, %v585_v62  ;;  %v610_v60 = vsub.f32 %v568_v33, %v600_v49  ;;  %v571_v63 = vpop.xlane.xlu1 %570  ;;  %v507_v62 = vmul.f32 0.6931472, %v887_v39 }
 0x1d3   : > { %v613_v48 = vmul.f32 9.2103405, %v605_v42  ;;  %v618_v5 = vmul.f32 9.2103405, %v610_v60 }
 0x1d5   : > { %v654_v53 = vsel %vm242_vm12, %v613_v48, 0.0  ;;  %v659_v28 = vsel %vm247_vm4, %v618_v5, 0.0 }
 0x1d6   : > { %v662_v31 = vsel %vm628_vm14, %v654_v53, 0.0  ;;  %v672_v17 = vsel %vm628_vm14, %v659_v28, 0.0 }
 0x1d7   : > { %v663_v22 = vadd.f32 %v662_v31, %v661_v61 }
 0x1d8   : > { %v603_v0 = vpop.xlane.xlu2 %602  ;;  %v536_v3 = vpop.xlane.xlu0 %535 }
 0x1d9   : > { %v665_v7 = vadd.f32 %v664_v35, %v663_v22  ;;  %v611_v8 = vsub.f32 %v571_v63, %v603_v0  ;;  %v546_v11 = vsub.f32 %v505_v34, %v536_v3 }
 0x1db   : > { %v667_v50 = vadd.f32 %v666_v36, %v665_v7  ;;  %v619_v12 = vmul.f32 9.2103405, %v611_v8  ;;  %v626_v13 = vsel %vm247_vm4, %v546_v11, 0.0 }
 0x1dc   : > { %v640_v1 = vsel %vm628_vm14, %v626_v13, 0.0 }
 0x1dd   : > { %v669_v14 = vadd.f32 %v668_v6, %v667_v50  ;;  %v641_v57 = vadd.f32 %v640_v1, %v639_v10  ;;  %v660_v20 = vsel %vm248_vm5, %v619_v12, 0.0 }
 0x1de   : > { %v674_v16 = vsel %vm628_vm14, %v660_v20, 0.0 }
 0x1df   : > { %v671_v44 = vadd.f32 %v670_v18, %v669_v14 }
 0x1e0   : > { %v539_v21 = vpop.xlane.xlu0 %538 }
 0x1e1   : > { %v547_v23 = vsub.f32 %v507_v62, %v539_v21  ;;  %v673_v24 = vadd.f32 %v672_v17, %v671_v44 }
 0x1e3   : > { %v627_v19 = vsel %vm248_vm5, %v547_v23, 0.0  ;;  %v675_v26 = vadd.f32 %v674_v16, %v673_v24 }
 0x1e4   : > { %v642_v43 = vsel %vm628_vm14, %v627_v19, 0.0 }
 0x1e5   : > { %676 = vadd.xlane.f32.xlu2 %v675_v26  ;;  %v643_v27 = vadd.f32 %v642_v43, %v641_v57 }
 0x1e7   : > { %644 = vadd.xlane.f32.xlu1 %v643_v27 }
 0x258   : > { %v677_v30 = vpop.xlane.xlu2 %676 }
 0x259   : > { %v678_v46 = vrot.slane %v677_v30, 4 }
 0x25a   : > { %v645_v10 = vpop.xlane.xlu1 %644 }
 0x25b   : > { %v679_v33 = vadd.f32 %v678_v46, %v677_v30  ;;  %v646_v38 = vrot.slane %v645_v10, 4 }
 0x25d   : > { %v680_v45 = vrot.slane %v679_v33, 2  ;;  %v647_v40 = vadd.f32 %v646_v38, %v645_v10 }
 0x25f   : > { %v681_v49 = vadd.f32 %v680_v45, %v679_v33  ;;  %v648_v41 = vrot.slane %v647_v40, 2 }
 0x261   : > { %v649_v29 = vadd.f32 %v648_v41, %v647_v40  ;;  %v682_v42 = vrot.slane %v681_v49, 1 }
 0x263   : > { %v650_v47 = vrot.slane %v649_v29, 1  ;;  %v683_v52 = vadd.f32 %v682_v42, %v681_v49 }
 0x265   : > { %v651_v51 = vadd.f32 %v650_v47, %v649_v29 }
 0x267   : > { %793 = vpush %v651_v51 }
 0x268   : > { %795 = vpush %v683_v52 }
 0x298   : > { %s794_s14 = spop %793 }
 0x299   : > { %v689_v56 = vstv %s794_s14  ;;  %s796_s17 = spop %795 }
 0x29a   : > { %v687_v48 = vstv %s796_s17 }
 0x29b   : > { %v688_v58 = vsel %vm686_vm6, %v687_v48, 0.0 }
 0x29c   : > { %v690_v59 = vsel %vm685_vm7, %v689_v56, %v688_v58 }
 0x29d   : > { %691 = vst [vmem:[%s177_s8] sm:$0xff] %v690_v59 }
 0x29e   : > { %915 = shalt.err (!%p912_p3)
}
 0x29f   : > { %797 = dma.vmem_to_hbm [thread:$0]  (%p1006_p5), %s706_s13, 128, %s708_s16, %s693_s22  }
 0x2a0 PF: > { %p803_p4 = scmp.ge.s32.totalorder %s950_s12, 2  ;;  %s719_s29 = sand.u32 1, %s938_s9  }
 0x2a1   : > { %s720_s30 = scalar_lea.sflag [#allocation3], %s719_s29 }
 0x2a2   : > { %p800_p7 = pnand %p803_p4, %p1010_p6 }
 0x2a4   : > { %p801_p8 = pneg %p800_p7 }
 0x2a6   : > { %933 = dma.done.wait (%p801_p8), %s720_s30, 128  }
 0x2a7   : > { %935 = vsyncadd (%p801_p8), %s720_s30, 4294967168  ;;  %p12_p9 = scmp.ge.s32.totalorder %s993_s15, 6   ;;  %s1412_s9 = smov %s942_s10 }
 0x2a8   : > { %s1413_s10 = smov %s946_s11  ;;  %s1414_s11 = smov %s1004_s18 }
 0x2a9   : > { %s1415_s12 = smov %s993_s15  ;;  %14 = sbr.rel (!%p12_p9) target bundleno = 3 (0x3), region = 66 }
 0x2ae   :  { %726 = vsyncpa [#allocation3], 1 }
 0x2af   :  { %728 = vsyncpa [#allocation3 + $0x1], 1 }

</bundles_post_ra>
